<compile_context>
chip_gen: v5e
topology: v5e:2x2
jax: 0.10.0
libtpu: 0.0.40
codegen_flags: <defaults>
</compile_context>

<pallas_src>
import functools

import jax
import jax.numpy as jnp
from jax import lax
from jax.experimental import pallas as pl
from jax.experimental.pallas import tpu as pltpu

STATE_DIM = 4          # CartPole-v1 observation dim
H1, H2, OUT = 64, 32, 1

LANE = 128             # TPU lane width
MAX_TILE = 2048        # max batch-tile (lanes) per grid step
CHUNK = 512            # target inner sub-slab (bounds vreg pressure)
SMALL_BATCH_XLA = 256  # below this, plain XLA beats a pallas launch


def _round_up(x, m):
    return ((x + m - 1) // m) * m


def _pick_tile(b_lane):
    """Lane-aligned batch tile; keep >= 2 tiles when possible (v7x megacore)."""
    if b_lane <= 2 * LANE:
        return b_lane
    half = _round_up((b_lane + 1) // 2, LANE)
    return min(MAX_TILE, half)


def _pick_chunk(tm):
    """Largest multiple-of-128 divisor of tm that is <= CHUNK."""
    q = tm // LANE
    for d in (4, 3, 2, 1):
        if q % d == 0 and d * LANE <= CHUNK:
            return d * LANE
    return LANE


def value_net_kernel(x_ref, w1_ref, b1_ref, w2_ref, b2_ref, w3c_ref, b3_ref,
                     o_ref, *, chunk):
    """One batch tile; batch rides the 128-lane axis for all intermediates.

    x_ref  : (TM, STATE_DIM)  input tile, native (batch, feature) layout
    w1_ref : (H1, STATE_DIM)  fc1 weight, PyTorch (out, in) layout
    b1_ref : (H1, 1)          f32
    w2_ref : (H2, H1)         fc2 weight
    b2_ref : (H2, 1)          f32
    w3c_ref: (H2, 1)          fc3 weight column, f32 (VPU path, off the MXU)
    b3_ref : (1,)             fc3 bias scalar in SMEM
    o_ref  : (1, TM)          lane-dense output tile
    """
    w1 = w1_ref[...]
    w2 = w2_ref[...]
    b1 = b1_ref[...]
    b2 = b2_ref[...]
    w3c = w3c_ref[...]
    b3 = b3_ref[0]
    n_chunks = x_ref.shape[0] // chunk

    def body(j, carry):
        start = pl.multiple_of(j * chunk, chunk)
        xc = x_ref[pl.ds(start, chunk), :]                       # (chunk, 4)

        # fc1 + ReLU: h1^T = W1 @ x^T -> (H1, chunk), batch on lanes.
        # dot_general contracts axis 1 of both operands (== W1 @ xc.T).
        h = lax.dot_general(w1, xc, (((1,), (1,)), ((), ())),
                            preferred_element_type=jnp.float32)
        h = jnp.maximum(h + b1, 0.0)

        # fc2 + ReLU: (H2, chunk); bias/ReLU stay f32 (v5e-safe epilogue).
        h = jnp.dot(w2, h.astype(w2.dtype), preferred_element_type=jnp.float32)
        h = jnp.maximum(h + b2, 0.0)

        # fc3: 32 -> 1 projection off the MXU (VPU multiply + sublane reduce).
        y = jnp.sum(h * w3c, axis=0, keepdims=True)              # (1, chunk)
        o_ref[:, pl.ds(start, chunk)] = (y + b3).astype(o_ref.dtype)
        return carry

    lax.fori_loop(0, n_chunks, body, 0, unroll=True)


@functools.partial(jax.jit, static_argnames=("compute_dtype",))
def _pallas_forward(x, params, compute_dtype=jnp.bfloat16):
    w1, b1, w2, b2, w3, b3 = params
    B = x.shape[0]

    b_lane = _round_up(B, LANE)
    tm = _pick_tile(b_lane)
    b_pad = _round_up(b_lane, tm)
    grid = (b_pad // tm,)
    chunk = _pick_chunk(tm)

    # Native (B, 4) layout; only pad rows (no wrapper-side transpose copy).
    x_pad = jnp.pad(x, ((0, b_pad - B), (0, 0))).astype(compute_dtype)
    w1m = w1.astype(compute_dtype)      # (H1, STATE_DIM)  MXU operand
    w2m = w2.astype(compute_dtype)      # (H2, H1)         MXU operand
    b1c = b1.reshape(H1, 1)             # f32 epilogue
    b2c = b2.reshape(H2, 1)             # f32 epilogue
    w3c = w3.reshape(H2, 1)             # f32 VPU path
    b3s = b3.reshape(1)                 # scalar -> SMEM

    itemsize = jnp.dtype(compute_dtype).itemsize
    flops = 2 * (H1 * STATE_DIM + H2 * H1 + H2) * b_pad
    bytes_accessed = (b_pad * STATE_DIM * itemsize          # x in
                      + b_pad * OUT * 4                     # out
                      + (H1 * STATE_DIM + H2 * H1) * itemsize
                      + (H1 + H2 + H2 + 1) * 4)             # biases + w3 col

    out_pad = pl.pallas_call(
        functools.partial(value_net_kernel, chunk=chunk),
        out_shape=jax.ShapeDtypeStruct((1, b_pad), jnp.float32),
        grid=grid,
        in_specs=[
            pl.BlockSpec((tm, STATE_DIM), lambda i: (i, 0)),    # x tile (streamed)
            pl.BlockSpec((H1, STATE_DIM), lambda i: (0, 0)),    # W1 (VMEM-resident)
            pl.BlockSpec((H1, 1), lambda i: (0, 0)),            # b1
            pl.BlockSpec((H2, H1), lambda i: (0, 0)),           # W2
            pl.BlockSpec((H2, 1), lambda i: (0, 0)),            # b2
            pl.BlockSpec((H2, 1), lambda i: (0, 0)),            # w3 column
            pl.BlockSpec(memory_space=pltpu.MemorySpace.SMEM),  # b3 scalar
        ],
        out_specs=pl.BlockSpec((1, tm), lambda i: (0, i)),
        compiler_params=pltpu.CompilerParams(
            dimension_semantics=("parallel",)),
        cost_estimate=pl.CostEstimate(
            flops=flops, transcendentals=0, bytes_accessed=bytes_accessed),
    )(x_pad, w1m, b1c, w2m, b2c, w3c, b3s)

    # Back to PyTorch (B, 1) shape.
    return out_pad[0, :B].reshape(B, OUT)


@jax.jit
def _xla_forward(x, params):
    w1, b1, w2, b2, w3, b3 = params
    h = jnp.maximum(x @ w1.T + b1, 0.0)
    h = jnp.maximum(h @ w2.T + b2, 0.0)
    return h @ w3.T + b3


def value_net_forward(x, params, compute_dtype=jnp.bfloat16, use_pallas=None):
    """x: (B, STATE_DIM) f32 -> (B, 1) f32.  params in PyTorch layout."""
    B = x.shape[0]
    if use_pallas is None:
        use_pallas = B > SMALL_BATCH_XLA      # static (shape-derived) dispatch
    if not use_pallas:
        return _xla_forward(x, params)
    return _pallas_forward(x, params, compute_dtype=compute_dtype)


def init_params(key):
    """PyTorch nn.Linear default init: U(-1/sqrt(fan_in), 1/sqrt(fan_in)),
    weights in PyTorch (out_features, in_features) layout."""
    def linear(key, fan_in, fan_out):
        kw, kb = jax.random.split(key)
        bound = 1.0 / jnp.sqrt(jnp.float32(fan_in))
        w = jax.random.uniform(kw, (fan_out, fan_in), jnp.float32, -bound, bound)
        b = jax.random.uniform(kb, (fan_out,), jnp.float32, -bound, bound)
        return w, b

    k1, k2, k3 = jax.random.split(key, 3)
    w1, b1 = linear(k1, STATE_DIM, H1)
    w2, b2 = linear(k2, H1, H2)
    w3, b3 = linear(k3, H2, OUT)
    return w1, b1, w2, b2, w3, b3


def reference_forward(x, params):
    w1, b1, w2, b2, w3, b3 = params
    h = jnp.maximum(x @ w1.T + b1, 0.0)
    h = jnp.maximum(h @ w2.T + b2, 0.0)
    return h @ w3.T + b3


if __name__ == "__main__":
    key = jax.random.PRNGKey(0)
    kp, kx1, kx2, kx3 = jax.random.split(key, 4)
    params = init_params(kp)

    # 1) Small batch forced through the Pallas kernel in f32 (strict check).
    x_small = jax.random.normal(kx1, (8, STATE_DIM), jnp.float32)
    out_small = jax.block_until_ready(
        value_net_forward(x_small, params, compute_dtype=jnp.float32,
                          use_pallas=True))
    ref_small = reference_forward(x_small, params)
    assert out_small.shape == (8, OUT)
    assert jnp.allclose(out_small, ref_small, atol=1e-4, rtol=1e-4), \
        "mismatch vs reference (B=8, f32 pallas)"

    # 2) Small batch via the default dispatch (XLA fast path).
    out_xla = jax.block_until_ready(value_net_forward(x_small, params))
    assert jnp.allclose(out_xla, ref_small, atol=1e-5, rtol=1e-5), \
        "mismatch vs reference (B=8, XLA path)"

    # 3) Larger batch: multi-tile grid, default bf16 MXU operands (loose check).
    x_big = jax.random.normal(kx2, (1000, STATE_DIM), jnp.float32)
    out_big = jax.block_until_ready(value_net_forward(x_big, params))
    ref_big = reference_forward(x_big, params)
    assert out_big.shape == (1000, OUT)
    assert jnp.allclose(out_big, ref_big, atol=5e-2, rtol=5e-2), \
        "mismatch vs reference (B=1000, bf16 pallas)"

    # 4) Large batch, f32 pallas: exercises the multi-chunk inner loop path.
    x_big2 = jax.random.normal(kx3, (4096, STATE_DIM), jnp.float32)
    out_big2 = jax.block_until_ready(
        value_net_forward(x_big2, params, compute_dtype=jnp.float32))
    ref_big2 = reference_forward(x_big2, params)
    assert out_big2.shape == (4096, OUT)
    assert jnp.allclose(out_big2, ref_big2, atol=1e-4, rtol=1e-4), \
        "mismatch vs reference (B=4096, f32 pallas)"

    print("KERNEL_OK")
</pallas_src>

<mosaic_0001>
module attributes {stable_mosaic.version = 11 : i64} {
  func.func @value_net_kernel(%arg0: i32, %arg1: memref<128x4xf32, #tpu.memory_space<vmem>>, %arg2: memref<64x4xf32, #tpu.memory_space<vmem>>, %arg3: memref<64x1xf32, #tpu.memory_space<vmem>>, %arg4: memref<32x64xf32, #tpu.memory_space<vmem>>, %arg5: memref<32x1xf32, #tpu.memory_space<vmem>>, %arg6: memref<32x1xf32, #tpu.memory_space<vmem>>, %arg7: memref<1xf32, #tpu.memory_space<smem>>, %arg8: memref<1x128xf32, #tpu.memory_space<vmem>>) attributes {dimension_semantics = [#tpu.dimension_semantics<parallel>], iteration_bounds = array<i64: 1>, scalar_prefetch = 0 : i64, scratch_operands = 0 : i64, tpu.core_type = #tpu.core_type<tc>, window_params = [{transform_indices = @transform_0, window_bounds = array<i64: 128, 4>}, {pipeline_mode = #tpu.pipeline_mode<synchronous>, transform_indices = @transform_1, window_bounds = array<i64: 64, 4>}, {pipeline_mode = #tpu.pipeline_mode<synchronous>, transform_indices = @transform_2, window_bounds = array<i64: 64, 1>}, {pipeline_mode = #tpu.pipeline_mode<synchronous>, transform_indices = @transform_3, window_bounds = array<i64: 32, 64>}, {pipeline_mode = #tpu.pipeline_mode<synchronous>, transform_indices = @transform_4, window_bounds = array<i64: 32, 1>}, {pipeline_mode = #tpu.pipeline_mode<synchronous>, transform_indices = @transform_5, window_bounds = array<i64: 32, 1>}, {transform_indices = @transform_6, window_bounds = array<i64: 1>}, {transform_indices = @transform_7, window_bounds = array<i64: 1, 128>}]} {
    %c0 = arith.constant 0 : index
    %c0_0 = arith.constant 0 : index
    %0 = vector.load %arg2[%c0, %c0_0] : memref<64x4xf32, #tpu.memory_space<vmem>>, vector<64x4xf32>
    %c0_1 = arith.constant 0 : index
    %c0_2 = arith.constant 0 : index
    %1 = vector.load %arg4[%c0_1, %c0_2] : memref<32x64xf32, #tpu.memory_space<vmem>>, vector<32x64xf32>
    %c0_3 = arith.constant 0 : index
    %c0_4 = arith.constant 0 : index
    %2 = vector.load %arg3[%c0_3, %c0_4] : memref<64x1xf32, #tpu.memory_space<vmem>>, vector<64x1xf32>
    %c0_5 = arith.constant 0 : index
    %c0_6 = arith.constant 0 : index
    %3 = vector.load %arg5[%c0_5, %c0_6] : memref<32x1xf32, #tpu.memory_space<vmem>>, vector<32x1xf32>
    %c0_7 = arith.constant 0 : index
    %c0_8 = arith.constant 0 : index
    %4 = vector.load %arg6[%c0_7, %c0_8] : memref<32x1xf32, #tpu.memory_space<vmem>>, vector<32x1xf32>
    %c0_9 = arith.constant 0 : index
    %5 = memref.load %arg7[%c0_9] : memref<1xf32, #tpu.memory_space<smem>>
    %c0_i32 = arith.constant 0 : i32
    %c128_i32 = arith.constant 128 : i32
    %6 = arith.muli %c0_i32, %c128_i32 : i32
    %7 = tpu.assume_multiple %6, 128 : i32
    %8 = arith.index_cast %7 : i32 to index
    %c0_10 = arith.constant 0 : index
    %9 = vector.load %arg1[%8, %c0_10] : memref<128x4xf32, #tpu.memory_space<vmem>>, vector<128x4xf32>
    %cst = arith.constant dense<0.000000e+00> : vector<64x128xf32>
    %10 = tpu.matmul %0, %9, %cst {dimension_numbers = #tpu.dot_dimension_numbers<[1], [1], [0], [0], [0, 0, 1, 0], [], []>} : vector<64x4xf32>, vector<128x4xf32>, vector<64x128xf32> -> vector<64x128xf32>
    %11 = vector.broadcast %2 : vector<64x1xf32> to vector<64x128xf32>
    %12 = arith.addf %10, %11 : vector<64x128xf32>
    %cst_11 = arith.constant 0.000000e+00 : f32
    %13 = vector.broadcast %cst_11 : f32 to vector<64x128xf32>
    %14 = arith.maximumf %12, %13 : vector<64x128xf32>
    %cst_12 = arith.constant dense<0.000000e+00> : vector<32x128xf32>
    %15 = tpu.matmul %1, %14, %cst_12 {dimension_numbers = #tpu.dot_dimension_numbers<[1], [0], [0], [1], [0, 0, 1, 1], [], []>} : vector<32x64xf32>, vector<64x128xf32>, vector<32x128xf32> -> vector<32x128xf32>
    %16 = vector.broadcast %3 : vector<32x1xf32> to vector<32x128xf32>
    %17 = arith.addf %15, %16 : vector<32x128xf32>
    %cst_13 = arith.constant 0.000000e+00 : f32
    %18 = vector.broadcast %cst_13 : f32 to vector<32x128xf32>
    %19 = arith.maximumf %17, %18 : vector<32x128xf32>
    %20 = vector.broadcast %4 : vector<32x1xf32> to vector<32x128xf32>
    %21 = arith.mulf %19, %20 : vector<32x128xf32>
    %cst_14 = arith.constant dense<0.000000e+00> : vector<128xf32>
    %22 = vector.multi_reduction <add>, %21, %cst_14 [0] : vector<32x128xf32> to vector<128xf32>
    %23 = vector.shape_cast %22 : vector<128xf32> to vector<1x128xf32>
    %24 = vector.broadcast %5 : f32 to vector<1x128xf32>
    %25 = arith.addf %23, %24 : vector<1x128xf32>
    %c0_15 = arith.constant 0 : index
    %26 = arith.index_cast %7 : i32 to index
    %27 = vector.load %arg8[%c0_15, %26] : memref<1x128xf32, #tpu.memory_space<vmem>>, vector<1x128xf32>
    tpu.vector_store %arg8[%c0_15, %26], %25 {strides = array<i32>} : memref<1x128xf32, #tpu.memory_space<vmem>>, vector<1x128xf32>,
    %c1_i32 = arith.constant 1 : i32
    return
  }
  func.func @transform_0(%arg0: i32) -> (i32, i32) {
    %c0_i32 = arith.constant 0 : i32
    %c0_i32_0 = arith.constant 0 : i32
    return %arg0, %c0_i32 : i32, i32
  }
  func.func @transform_1(%arg0: i32) -> (i32, i32) {
    %c0_i32 = arith.constant 0 : i32
    %c0_i32_0 = arith.constant 0 : i32
    %c0_i32_1 = arith.constant 0 : i32
    return %c0_i32, %c0_i32_0 : i32, i32
  }
  func.func @transform_2(%arg0: i32) -> (i32, i32) {
    %c0_i32 = arith.constant 0 : i32
    %c0_i32_0 = arith.constant 0 : i32
    %c0_i32_1 = arith.constant 0 : i32
    return %c0_i32, %c0_i32_0 : i32, i32
  }
  func.func @transform_3(%arg0: i32) -> (i32, i32) {
    %c0_i32 = arith.constant 0 : i32
    %c0_i32_0 = arith.constant 0 : i32
    %c0_i32_1 = arith.constant 0 : i32
    return %c0_i32, %c0_i32_0 : i32, i32
  }
  func.func @transform_4(%arg0: i32) -> (i32, i32) {
    %c0_i32 = arith.constant 0 : i32
    %c0_i32_0 = arith.constant 0 : i32
    %c0_i32_1 = arith.constant 0 : i32
    return %c0_i32, %c0_i32_0 : i32, i32
  }
  func.func @transform_5(%arg0: i32) -> (i32, i32) {
    %c0_i32 = arith.constant 0 : i32
    %c0_i32_0 = arith.constant 0 : i32
    %c0_i32_1 = arith.constant 0 : i32
    return %c0_i32, %c0_i32_0 : i32, i32
  }
  func.func @transform_6(%arg0: i32) -> i32 {
    %c0_i32 = arith.constant 0 : i32
    %c0_i32_0 = arith.constant 0 : i32
    return %c0_i32 : i32
  }
  func.func @transform_7(%arg0: i32) -> (i32, i32) {
    %c0_i32 = arith.constant 0 : i32
    %c0_i32_0 = arith.constant 0 : i32
    return %c0_i32, %arg0 : i32, i32
  }
}

</mosaic_0001>

<bundles_post_ra>
// kernel: _pallas_forward.1
= control target key start
LH: loop header
LB: loop body
LE: loop exit
PB: predicated region body
PF: predicated region fallthrough
CT: control target
= control target key end

     0   :  { %vm112_vm0 = vcmask 31744   ;;  %v404_v11 = vmov 0   ;;  %vm254_vm1 = vcmask 523264   ;;  %s639_s0 = inlined_call_operand.vmem [shape: f32[128,4], index: 0, kind: input, shape index: {}]   ;;  %s640_s2 = inlined_call_operand.vmem [shape: f32[64,1], index: 2, kind: input, shape index: {}]   ;;  %s641_s4 = inlined_call_operand.vmem [shape: f32[32,1], index: 4, kind: input, shape index: {}]   ;;  %s642_s1 = inlined_call_operand.vmem [shape: f32[64,4], index: 1, kind: input, shape index: {}]   ;;  %s643_s5 = inlined_call_operand.vmem [shape: f32[32,1], index: 5, kind: input, shape index: {}]   ;;  %s644_s3 = inlined_call_operand.vmem [shape: f32[32,64], index: 3, kind: input, shape index: {}]   ;;  %s645_s6 = inlined_call_operand.<no memory space> [shape: f32[1], index: 6, kind: input, shape index: {}]   ;;  %s646_s7 = inlined_call_operand.vmem [shape: f32[1,128], index: 7, kind: output, shape index: {}]  }
   0x1   :  { %v71_v0 = vld [vmem:[%s639_s0 + $0x78] sm:$0xff]  ;;  %v70_v1 = vld [vmem:[%s639_s0 + $0x70] sm:$0xff]  ;;  %v69_v2 = vld [vmem:[%s639_s0 + $0x68] sm:$0xff]  ;;  %401 = vset.pattern.permute.xlu0 %v404_v11  ;;  %402 = vset.pattern.permute.xlu1 %v404_v11 }
   0x2   :  { %369 = vmatpush.xpose.msk.msra.mxu3 %vm112_vm0, %v71_v0  ;;  %368 = vmatpush.xpose.msk.msra.mxu2 %vm112_vm0, %v71_v0  ;;  %v68_v3 = vld [vmem:[%s639_s0 + $0x60] sm:$0xff]  ;;  %v67_v4 = vld [vmem:[%s639_s0 + $0x58] sm:$0xff]  ;;  %v66_v5 = vld [vmem:[%s639_s0 + $0x50] sm:$0xff] }
   0x3   :  { %340 = vmatpush.xpose.msk.msra.mxu0 %vm112_vm0, %v71_v0  ;;  %v65_v6 = vld [vmem:[%s639_s0 + $0x48] sm:$0xff]  ;;  %v64_v7 = vld [vmem:[%s639_s0 + $0x40] sm:$0xff]  ;;  %v63_v8 = vld [vmem:[%s639_s0 + $0x38] sm:$0xff]  ;;  %403 = vset.pattern.permute.xlu2 %v404_v11 }
   0x4   :  { %v46_v9 = vld [vmem:[%s640_s2 + $0x38] sm:$0xff]  ;;  %v62_v10 = vld [vmem:[%s639_s0 + $0x30] sm:$0xff]  ;;  %v61_v12 = vld [vmem:[%s639_s0 + $0x28] sm:$0xff] }
   0x5   :  { %109 = vperm.xlu0 %401, %v46_v9   ;;  %v45_v13 = vld [vmem:[%s640_s2 + $0x30] sm:$0xff]  ;;  %v44_v14 = vld [vmem:[%s640_s2 + $0x28] sm:$0xff]  ;;  %v60_v15 = vld [vmem:[%s639_s0 + $0x20] sm:$0xff] }
   0x6   :  { %371 = vmatpush.xpose.msk.msra.mxu3 %vm112_vm0, %v70_v1  ;;  %370 = vmatpush.xpose.msk.msra.mxu2 %vm112_vm0, %v70_v1  ;;  %v59_v16 = vld [vmem:[%s639_s0 + $0x18] sm:$0xff]  ;;  %v40_v17 = vld [vmem:[%s640_s2 + $0x8] sm:$0xff]  ;;  %v43_v18 = vld [vmem:[%s640_s2 + $0x20] sm:$0xff] }
   0x7   :  { %341 = vmatpush.xpose.msk.msra.mxu0 %vm112_vm0, %v70_v1  ;;  %99 = vperm.xlu1 %402, %v44_v14   ;;  %v58_v19 = vld [vmem:[%s639_s0 + $0x10] sm:$0xff]  ;;  %v57_v20 = vld [vmem:[%s639_s0 + $0x8] sm:$0xff]  ;;  %v39_v22 = vld [vmem:[%s640_s2] sm:$0xff] }
   0x8   :  { %v48_v21 = vld [vmem:[%s641_s4 + $0x8] sm:$0xff]  ;;  %v56_v23 = vld [vmem:[%s639_s0] sm:$0xff]  ;;  %v30_v24 = vld [vmem:[%s642_s1 + $0x18] sm:$0xff] }
   0x9   :  { %v28_v25 = vld [vmem:[%s642_s1 + $0x8] sm:$0xff]  ;;  %v51_v26 = vld [vmem:[%s643_s5] sm:$0xff]  ;;  %v49_v28 = vld [vmem:[%s641_s4 + $0x10] sm:$0xff] }
   0xa   :  { %373 = vmatpush.xpose.msk.msra.mxu3 %vm112_vm0, %v69_v2  ;;  %372 = vmatpush.xpose.msk.msra.mxu2 %vm112_vm0, %v69_v2  ;;  %v27_v27 = vld [vmem:[%s642_s1] sm:$0xff]  ;;  %v42_v29 = vld [vmem:[%s640_s2 + $0x18] sm:$0xff]  ;;  %v29_v31 = vld [vmem:[%s642_s1 + $0x10] sm:$0xff] }
   0xb   :  { %342 = vmatpush.xpose.msk.msra.mxu0 %vm112_vm0, %v69_v2  ;;  %89 = vperm.xlu2 %403, %v42_v29   ;;  %v31_v30 = vld [vmem:[%s642_s1 + $0x20] sm:$0xff]  ;;  %v52_v32 = vld [vmem:[%s643_s5 + $0x8] sm:$0xff]  ;;  %v41_v33 = vld [vmem:[%s640_s2 + $0x10] sm:$0xff] }
   0xc   :  { %v54_v34 = vld [vmem:[%s643_s5 + $0x18] sm:$0xff]  ;;  %v32_v35 = vld [vmem:[%s642_s1 + $0x28] sm:$0xff]  ;;  %v47_v36 = vld [vmem:[%s641_s4] sm:$0xff] }
   0xd   :  { %104 = vperm.xlu0 %401, %v45_v13   ;;  %v33_v37 = vld [vmem:[%s642_s1 + $0x30] sm:$0xff]  ;;  %v50_v38 = vld [vmem:[%s641_s4 + $0x18] sm:$0xff]  ;;  %v35_v9 = vld [vmem:[%s644_s3] sm:$0xff] }
   0xe   :  { %375 = vmatpush.xpose.msk.msra.mxu3 %vm112_vm0, %v68_v3  ;;  %374 = vmatpush.xpose.msk.msra.mxu2 %vm112_vm0, %v68_v3  ;;  %v34_v39 = vld [vmem:[%s642_s1 + $0x38] sm:$0xff]  ;;  %v53_v40 = vld [vmem:[%s643_s5 + $0x10] sm:$0xff] }
   0xf   :  { %343 = vmatpush.xpose.msk.msra.mxu0 %vm112_vm0, %v68_v3  ;;  %94 = vperm.xlu1 %402, %v43_v18   ;;  %v37_v11 = vld [vmem:[%s644_s3 + $0x10] sm:$0xff] }
  0x12   :  { %377 = vmatpush.xpose.msk.msra.mxu3 %vm112_vm0, %v67_v4  ;;  %376 = vmatpush.xpose.msk.msra.mxu2 %vm112_vm0, %v67_v4 }
  0x13   :  { %344 = vmatpush.xpose.msk.msra.mxu0 %vm112_vm0, %v67_v4  ;;  %84 = vperm.xlu2 %403, %v41_v33  }
  0x15   :  { %79 = vperm.xlu0 %401, %v40_v17  }
  0x16   :  { %379 = vmatpush.xpose.msk.msra.mxu3 %vm112_vm0, %v66_v5  ;;  %378 = vmatpush.xpose.msk.msra.mxu2 %vm112_vm0, %v66_v5 }
  0x17   :  { %345 = vmatpush.xpose.msk.msra.mxu0 %vm112_vm0, %v66_v5  ;;  %74 = vperm.xlu1 %402, %v39_v22  }
  0x1a   :  { %381 = vmatpush.xpose.msk.msra.mxu3 %vm112_vm0, %v65_v6  ;;  %380 = vmatpush.xpose.msk.msra.mxu2 %vm112_vm0, %v65_v6 }
  0x1b   :  { %346 = vmatpush.xpose.msk.msra.mxu0 %vm112_vm0, %v65_v6  ;;  %236 = vperm.xlu2 %403, %v47_v36  }
  0x1d   :  { %241 = vperm.xlu0 %401, %v48_v21  }
  0x1e   :  { %383 = vmatpush.xpose.msk.msra.mxu3 %vm112_vm0, %v64_v7  ;;  %382 = vmatpush.xpose.msk.msra.mxu2 %vm112_vm0, %v64_v7 }
  0x1f   :  { %347 = vmatpush.xpose.msk.msra.mxu0 %vm112_vm0, %v64_v7  ;;  %246 = vperm.xlu1 %402, %v49_v28  }
  0x22   :  { %385 = vmatpush.xpose.msk.msra.mxu3 %vm112_vm0, %v63_v8  ;;  %384 = vmatpush.xpose.msk.msra.mxu2 %vm112_vm0, %v63_v8 }
  0x23   :  { %348 = vmatpush.xpose.msk.msra.mxu0 %vm112_vm0, %v63_v8  ;;  %251 = vperm.xlu2 %403, %v50_v38  }
  0x25   :  { %302 = vperm.xlu0 %401, %v51_v26  }
  0x26   :  { %387 = vmatpush.xpose.msk.msra.mxu3 %vm112_vm0, %v62_v10  ;;  %386 = vmatpush.xpose.msk.msra.mxu2 %vm112_vm0, %v62_v10 }
  0x27   :  { %349 = vmatpush.xpose.msk.msra.mxu0 %vm112_vm0, %v62_v10  ;;  %307 = vperm.xlu1 %402, %v52_v32   ;;  %v36_v10 = vld [vmem:[%s644_s3 + $0x8] sm:$0xff] }
  0x2a   :  { %389 = vmatpush.xpose.msk.msra.mxu3 %vm112_vm0, %v61_v12  ;;  %388 = vmatpush.xpose.msk.msra.mxu2 %vm112_vm0, %v61_v12 }
  0x2b   :  { %350 = vmatpush.xpose.msk.msra.mxu0 %vm112_vm0, %v61_v12  ;;  %312 = vperm.xlu2 %403, %v53_v40   ;;  %v38_v12 = vld [vmem:[%s644_s3 + $0x18] sm:$0xff] }
  0x2d   :  { %317 = vperm.xlu0 %401, %v54_v34  }
  0x2e   :  { %391 = vmatpush.xpose.msk.msra.mxu3 %vm112_vm0, %v60_v15  ;;  %390 = vmatpush.xpose.msk.msra.mxu2 %vm112_vm0, %v60_v15 }
  0x2f   :  { %351 = vmatpush.xpose.msk.msra.mxu0 %vm112_vm0, %v60_v15 }
  0x32   :  { %393 = vmatpush.xpose.msk.msra.mxu3 %vm112_vm0, %v59_v16  ;;  %392 = vmatpush.xpose.msk.msra.mxu2 %vm112_vm0, %v59_v16 }
  0x33   :  { %352 = vmatpush.xpose.msk.msra.mxu0 %vm112_vm0, %v59_v16 }
  0x36   :  { %395 = vmatpush.xpose.msk.msra.mxu3 %vm112_vm0, %v58_v19  ;;  %394 = vmatpush.xpose.msk.msra.mxu2 %vm112_vm0, %v58_v19 }
  0x37   :  { %353 = vmatpush.xpose.msk.msra.mxu0 %vm112_vm0, %v58_v19 }
  0x3a   :  { %397 = vmatpush.xpose.msk.msra.mxu3 %vm112_vm0, %v57_v20  ;;  %396 = vmatpush.xpose.msk.msra.mxu2 %vm112_vm0, %v57_v20 }
  0x3b   :  { %354 = vmatpush.xpose.msk.msra.mxu0 %vm112_vm0, %v57_v20 }
  0x3e   :  { %399 = vmatpush.xpose.msk.msra.mxu3 %vm112_vm0, %v56_v23  ;;  %398 = vmatpush.xpose.msk.msra.mxu2 %vm112_vm0, %v56_v23 }
  0x3f   :  { %355 = vmatpush.xpose.msk.msra.mxu0 %vm112_vm0, %v56_v23 }
  0x41   :  { %359 = vmatmul.msk.f32.vlgmr.msra.gmra.mxu3 %vm112_vm0, %v30_v24  ;;  %357 = vmatmul.msk.f32.vlgmr.msra.gmra.mxu2 %vm112_vm0, %v28_v25 }
  0x42   :  { %356 = vmatmul.msk.f32.vlgmr.msra.gmra.mxu0 %vm112_vm0, %v27_v27 }
  0x49   :  { %360 = vmatmul.msk.f32.gmra.mxu3 %vm112_vm0, %v31_v30  ;;  %358 = vmatmul.msk.f32.gmra.mxu2 %vm112_vm0, %v29_v31 }
  0x51   :  { %361 = vmatmul.msk.f32.gmra.mxu3 %vm112_vm0, %v32_v35 }
  0x59   :  { %362 = vmatmul.msk.f32.gmra.mxu3 %vm112_vm0, %v33_v37 }
  0x61   :  { %363 = vmatmul.msk.f32.gmra.mxu3 %vm112_vm0, %v34_v39 }
  0x65   :  { %v90_v48 = vpop.permute.xlu2 %89 }
  0x6d   :  { %v85_v61 = vpop.permute.xlu2 %84 }
  0x75   :  { %v237_v14 = vpop.permute.xlu2 %236 }
  0x77   :  { %v110_v44 = vpop.permute.xlu0 %109 }
  0x79   :  { %v100_v45 = vpop.permute.xlu1 %99 }
  0x7d   :  { %v252_v18 = vpop.permute.xlu2 %251 }
  0x7f   :  { %v105_v49 = vpop.permute.xlu0 %104 }
  0x81   :  { %v95_v53 = vpop.permute.xlu1 %94 }
  0x85   :  { %v313_v29 = vpop.permute.xlu2 %312 }
  0x87   :  { %v80_v0 = vpop.permute.xlu0 %79 }
  0x89   :  { %v75_v4 = vpop.permute.xlu1 %74 }
  0x8f   :  { %v242_v15 = vpop.permute.xlu0 %241 }
  0x91   :  { %v247_v17 = vpop.permute.xlu1 %246 }
  0x97   :  { %v303_v23 = vpop.permute.xlu0 %302 }
  0x99   :  { %v308_v27 = vpop.permute.xlu1 %307 }
  0x9f   :  { %v318_v36 = vpop.permute.xlu0 %317 }
  0xbf   :  { %v202_v1 = vpop.f32.mrf.mxu0 }
  0xc0   :  { %v203_v5 = vadd.f32 %v202_v1, %v75_v4 }
  0xc2   :  { %v226_v8 = vmax.f32 %v203_v5, 0.0 }
  0xc4   :  { %v211_v41 = vpop.f32.mrf.mxu3  ;;  %v205_v47 = vpop.f32.mrf.mxu2 }
  0xc5   :  { %v212_v59 = vadd.f32 %v211_v41, %v90_v48  ;;  %v206_v3 = vadd.f32 %v205_v47, %v80_v0 }
  0xc7   :  { %v229_v2 = vmax.f32 %v212_v59, 0.0  ;;  %v227_v7 = vmax.f32 %v206_v3, 0.0 }
  0xcc   :  { %v214_v42 = vpop.f32.mrf.mxu3  ;;  %v208_v58 = vpop.f32.mrf.mxu2 }
  0xcd   :  { %v215_v56 = vadd.f32 %v214_v42, %v95_v53  ;;  %v209_v63 = vadd.f32 %v208_v58, %v85_v61 }
  0xcf   :  { %v230_v62 = vmax.f32 %v215_v56, 0.0  ;;  %v228_v6 = vmax.f32 %v209_v63, 0.0 }
  0xd4   :  { %v217_v43 = vpop.f32.mrf.mxu3 }
  0xd5   :  { %v218_v54 = vadd.f32 %v217_v43, %v100_v45  ;;  %v333_v45 = vstv %s645_s6 }
  0xd7   :  { %v231_v60 = vmax.f32 %v218_v54, 0.0 }
  0xdc   :  { %v220_v46 = vpop.f32.mrf.mxu3 }
  0xdd   :  { %v221_v51 = vadd.f32 %v220_v46, %v105_v49 }
  0xdf   :  { %v232_v57 = vmax.f32 %v221_v51, 0.0 }
  0xe4   :  { %v223_v50 = vpop.f32.mrf.mxu3 }
  0xe5   :  { %v224_v52 = vadd.f32 %v223_v50, %v110_v44 }
  0xe7   :  { %v233_v55 = vmax.f32 %v224_v52, 0.0 }
  0xe9   :  { %275 = vmatpush.msra.mxu1 %v233_v55 }
  0xeb   :  { %276 = vmatpush.msra.mxu1 %v232_v57 }
  0xed   :  { %277 = vmatpush.msra.mxu1 %v231_v60 }
  0xef   :  { %278 = vmatpush.msra.mxu1 %v230_v62 }
  0xf1   :  { %279 = vmatpush.msra.mxu1 %v229_v2 }
  0xf3   :  { %280 = vmatpush.msra.mxu1 %v228_v6 }
  0xf5   :  { %281 = vmatpush.msra.mxu1 %v227_v7 }
  0xf7   :  { %282 = vmatpush.msra.mxu1 %v226_v8 }
  0xf8   :  { %364 = vmatmul.msk.f32.vlgmr.msra.gmra.mxu1 %vm254_vm1, %v35_v9 }
 0x100   :  { %365 = vmatmul.msk.f32.gmra.mxu1 %vm254_vm1, %v36_v10 }
 0x108   :  { %366 = vmatmul.msk.f32.gmra.mxu1 %vm254_vm1, %v37_v11 }
 0x110   :  { %367 = vmatmul.msk.f32.gmra.mxu1 %vm254_vm1, %v38_v12 }
 0x175   :  { %v284_v13 = vpop.f32.mrf.mxu1 }
 0x176   :  { %v285_v21 = vadd.f32 %v284_v13, %v237_v14 }
 0x178   :  { %v296_v25 = vmax.f32 %v285_v21, 0.0 }
 0x17a   :  { %v320_v31 = vmul.f32 %v303_v23, %v296_v25 }
 0x17d   :  { %v287_v16 = vpop.f32.mrf.mxu1 }
 0x17e   :  { %v288_v19 = vadd.f32 %v287_v16, %v242_v15 }
 0x180   :  { %v297_v24 = vmax.f32 %v288_v19, 0.0 }
 0x182   :  { %v321_v28 = vmul.f32 %v308_v27, %v297_v24 }
 0x184   :  { %v324_v34 = vadd.f32 %v321_v28, %v320_v31 }
 0x185   :  { %v290_v20 = vpop.f32.mrf.mxu1 }
 0x186   :  { %v291_v22 = vadd.f32 %v290_v20, %v247_v17 }
 0x188   :  { %v298_v26 = vmax.f32 %v291_v22, 0.0 }
 0x18a   :  { %v322_v32 = vmul.f32 %v313_v29, %v298_v26 }
 0x18c   :  { %v325_v37 = vadd.f32 %v324_v34, %v322_v32 }
 0x18d   :  { %v293_v30 = vpop.f32.mrf.mxu1 }
 0x18e   :  { %v294_v33 = vadd.f32 %v293_v30, %v252_v18 }
 0x190   :  { %v299_v35 = vmax.f32 %v294_v33, 0.0 }
 0x192   :  { %v323_v38 = vmul.f32 %v318_v36, %v299_v35 }
 0x194   :  { %v326_v39 = vadd.f32 %v325_v37, %v323_v38 }
 0x196   :  { %v327_v40 = vrot.slane %v326_v39, 4 }
 0x198   :  { %v328_v41 = vadd.f32 %v327_v40, %v326_v39 }
 0x19a   :  { %v329_v42 = vrot.slane %v328_v41, 2 }
 0x19c   :  { %v330_v43 = vadd.f32 %v329_v42, %v328_v41 }
 0x19e   :  { %v331_v44 = vrot.slane %v330_v43, 1 }
 0x1a0   :  { %v332_v46 = vadd.f32 %v331_v44, %v330_v43 }
 0x1a2   :  { %v334_v47 = vadd.f32 %v333_v45, %v332_v46 }
 0x1a4   :  { %335 = vst [vmem:[%s646_s7] sm:$0x1] %v334_v47 }

</bundles_post_ra>
